<compile_context>
chip_gen: v5e
topology: v5e:2x2
jax: 0.10.0
libtpu: 0.0.40
codegen_flags: <defaults>
</compile_context>

<pallas_src>
import functools

import jax
import jax.numpy as jnp
from jax.experimental import pallas as pl
from jax.experimental.pallas import tpu as pltpu


def _tpu_hw_defaults():
    """Best-effort generation query: (vmem_capacity_bytes, num_tensorcores)."""
    vmem_cap = 128 * 1024 * 1024
    num_cores = 1
    try:
        info = pltpu.get_tpu_info()
        vmem_cap = int(getattr(info, "vmem_capacity_bytes", vmem_cap))
        for name in ("num_cores", "core_count", "tensorcores_per_chip",
                     "num_tensorcores"):
            v = getattr(info, name, None)
            if v:
                num_cores = int(v)
                break
    except Exception:
        pass
    return vmem_cap, num_cores


def _auto_tile_p(C, itemsize, vmem_limit_bytes):
    """Pick a pixel tile so each logits block is ~1 MiB, capped by VMEM."""
    # ~1 MiB blocks keep the pipeline near the HBM roofline instead of being
    # bound by the ~0.35us fixed per-grid-step overhead.
    tp_target = (1 << 20) // max(1, C * itemsize)
    # Per-lane-column VMEM bytes: double-buffered inputs + f32 accumulators
    # (ce + inter + psum) + ~6 live (C, TP) f32 temporaries in the body.
    per_col = 2 * (C * itemsize + 4) + (2 * C + 1) * 4 + 6 * C * 4
    tp_vmem = int(0.6 * vmem_limit_bytes) // per_col
    tp = min(tp_target, tp_vmem, 8192)
    return max(512, (tp // 128) * 128)


def _segloss_kernel(logits_ref, tgt_ref, ce_ref, inter_ref, psum_ref,
                    acc_ce, acc_inter, acc_psum,
                    *, hw, tiles_per_core, tile_p):
    # logits_ref: (C, TP) float   tgt_ref: (1, TP) int32
    # ce_ref: (1, 1) f32          inter/psum_ref: (C, 1) f32
    # acc_ce: (1, TP) f32         acc_inter/acc_psum: (C, TP) f32
    c = pl.program_id(0)   # core-split index
    n = pl.program_id(1)   # batch index
    p = pl.program_id(2)   # pixel-tile index within this core's range

    first = (n == 0) & (p == 0)
    last = (n == pl.num_programs(1) - 1) & (p == pl.num_programs(2) - 1)

    @pl.when(first)
    def _():
        acc_ce[...] = jnp.zeros_like(acc_ce)
        acc_inter[...] = jnp.zeros_like(acc_inter)
        acc_psum[...] = jnp.zeros_like(acc_psum)

    logits = logits_ref[...].astype(jnp.float32)       # (C, TP)
    tgt = tgt_ref[...]                                 # (1, TP) int32
    C, TP = logits.shape

    # Lane-validity mask for ragged last tile / clamped (duplicated) tiles.
    pix_start = (c * tiles_per_core + p) * tile_p      # unclamped global offset
    lane = jax.lax.broadcasted_iota(jnp.int32, (1, TP), 1)
    valid = (pix_start + lane) < hw                    # (1, TP) bool

    cls_ids = jax.lax.broadcasted_iota(jnp.int32, (C, TP), 0)
    mask = cls_ids == tgt                              # (C, TP) bool one-hot

    # Numerically-stable log-softmax / softmax over class (sublane) axis.
    m = jnp.max(logits, axis=0, keepdims=True)         # (1, TP)
    e = jnp.exp(logits - m)                            # (C, TP)
    s = jnp.sum(e, axis=0, keepdims=True)              # (1, TP)
    lse = m + jnp.log(s)                               # (1, TP)
    # Fold the lane-validity mask into probs once; the accumulations below
    # then need no additional (C, TP) selects.
    probs = jnp.where(valid, e * pl.reciprocal(s, approx=True), 0.0)

    # Cross entropy per pixel: lse - logit[target].
    logit_t = jnp.sum(jnp.where(mask, logits, 0.0), axis=0, keepdims=True)
    ce_pix = lse - logit_t                             # (1, TP)

    # Lane-dense accumulation (pure VPU adds; no per-step XLU reductions).
    acc_ce[...] += jnp.where(valid, ce_pix, 0.0)
    acc_inter[...] += jnp.where(mask, probs, 0.0)
    acc_psum[...] += probs

    @pl.when(last)
    def _():
        ce_ref[...] = jnp.sum(acc_ce[...], axis=1, keepdims=True)
        inter_ref[...] = jnp.sum(acc_inter[...], axis=1, keepdims=True)
        psum_ref[...] = jnp.sum(acc_psum[...], axis=1, keepdims=True)


def seg_loss(out, y, *, tile_p=None, smooth=1.0, num_core_split=None,
             vmem_limit_bytes=None):
    """out: (N, C, H, W) float logits (f32 or bf16), y: (N, H, W) int labels."""
    N, C, H, W = out.shape
    HW = H * W
    P = N * HW
    itemsize = jnp.dtype(out.dtype).itemsize

    # Generation-aware defaults: VMEM headroom (v7x has only 64 MiB/TC) and
    # TensorCore count (core split only helps on 2-TC v7x).
    vmem_cap, num_cores = _tpu_hw_defaults()
    if vmem_limit_bytes is None:
        vmem_limit_bytes = int(0.75 * vmem_cap)   # ~96 MiB v5e/v6e, ~48 MiB v7x
    if num_core_split is None:
        num_core_split = max(1, num_cores)

    # Free, contiguous reshapes; no transpose, no dtype copy in HBM.
    logits = out.reshape(N, C, HW)
    tgt = y.reshape(N, 1, HW).astype(jnp.int32)

    # Effective pixel tile: auto-scaled to ~1 MiB logits blocks (or the
    # explicit override), full row if it fits.  Ragged last tile is masked
    # in-kernel.
    if tile_p is None:
        tp = _auto_tile_p(C, itemsize, vmem_limit_bytes)
    else:
        tp = max(128, (tile_p // 128) * 128)
    if HW <= tp:
        tp = HW

    num_pt = pl.cdiv(HW, tp)
    ncs = max(1, min(num_core_split, num_pt))
    tiles_per_core = pl.cdiv(num_pt, ncs)

    kernel = functools.partial(_segloss_kernel, hw=HW,
                               tiles_per_core=tiles_per_core, tile_p=tp)

    def pix_map(c, n, p):
        # Clamp fully-out-of-range tiles (their contributions are masked).
        return (n, 0, jnp.minimum(c * tiles_per_core + p, num_pt - 1))

    def acc_map(c, n, p):
        return (c, 0, 0)

    cost = pl.CostEstimate(
        flops=int(10 * C * P),
        transcendentals=int((C + 2) * P),
        bytes_accessed=int(logits.size * itemsize + tgt.size * 4
                           + ncs * (2 * C + 1) * 4),
    )

    ce_part, inter_part, psum_part = pl.pallas_call(
        kernel,
        out_shape=(
            jax.ShapeDtypeStruct((ncs, 1, 1), jnp.float32),
            jax.ShapeDtypeStruct((ncs, C, 1), jnp.float32),
            jax.ShapeDtypeStruct((ncs, C, 1), jnp.float32),
        ),
        grid_spec=pltpu.PrefetchScalarGridSpec(
            num_scalar_prefetch=0,
            grid=(ncs, N, tiles_per_core),
            in_specs=[
                pl.BlockSpec((None, C, tp), pix_map),
                pl.BlockSpec((None, 1, tp), pix_map),
            ],
            out_specs=[
                pl.BlockSpec((None, 1, 1), acc_map),
                pl.BlockSpec((None, C, 1), acc_map),
                pl.BlockSpec((None, C, 1), acc_map),
            ],
            scratch_shapes=[
                pltpu.VMEM((1, tp), jnp.float32),
                pltpu.VMEM((C, tp), jnp.float32),
                pltpu.VMEM((C, tp), jnp.float32),
            ],
        ),
        compiler_params=pltpu.CompilerParams(
            # Leading axis shards the pixel range across TensorCores on 2-TC
            # chips (no-op on 1-TC chips, where ncs defaults to 1).
            dimension_semantics=("parallel", "arbitrary", "arbitrary"),
            vmem_limit_bytes=vmem_limit_bytes,
        ),
        cost_estimate=cost,
    )(logits, tgt)

    # Per-class target counts: trivial label histogram, cheaper in plain JAX
    # than an extra (C, TP) accumulator inside the kernel.
    tsum = jnp.bincount(y.reshape(-1).astype(jnp.int32), length=C)
    tsum = tsum.astype(jnp.float32)

    ce = jnp.sum(ce_part) / P                                   # mean CE
    inter = jnp.sum(inter_part[:, :, 0], axis=0)                # (C,)
    psum = jnp.sum(psum_part[:, :, 0], axis=0)
    dice = (2.0 * inter + smooth) / (psum + tsum + smooth)
    dice_loss = 1.0 - jnp.mean(dice)
    return ce + dice_loss


def _seg_loss_ref(out, y, smooth=1.0):
    """Pure-JAX reference for sanity checking."""
    N, C, H, W = out.shape
    logits = out.astype(jnp.float32)
    logp = jax.nn.log_softmax(logits, axis=1)
    onehot = jax.nn.one_hot(y, C, axis=1, dtype=jnp.float32)  # (N, C, H, W)
    ce = -jnp.mean(jnp.sum(onehot * logp, axis=1))
    probs = jax.nn.softmax(logits, axis=1)
    inter = jnp.sum(probs * onehot, axis=(0, 2, 3))
    psum = jnp.sum(probs, axis=(0, 2, 3))
    tsum = jnp.sum(onehot, axis=(0, 2, 3))
    dice = (2.0 * inter + smooth) / (psum + tsum + smooth)
    return ce + (1.0 - jnp.mean(dice))


if __name__ == "__main__":
    key = jax.random.PRNGKey(0)
    k1, k2, k3, k4 = jax.random.split(key, 4)

    # Case 1: simple small shape, auto tile (single pixel tile per image).
    N, C, H, W = 2, 4, 16, 16
    out = jax.random.normal(k1, (N, C, H, W), dtype=jnp.float32)
    y = jax.random.randint(k2, (N, H, W), 0, C, dtype=jnp.int32)
    loss = jax.block_until_ready(seg_loss(out, y))
    ref = jax.block_until_ready(_seg_loss_ref(out, y))
    assert jnp.allclose(loss, ref, rtol=2e-3, atol=2e-3), (loss, ref)

    # Case 2: ragged pixel tiles + forced 2-way core split + clamped tile path.
    N2, C2, H2, W2 = 2, 4, 18, 18           # HW = 324, not a multiple of 128
    out2 = jax.random.normal(k3, (N2, C2, H2, W2), dtype=jnp.float32)
    y2 = jax.random.randint(k4, (N2, H2, W2), 0, C2, dtype=jnp.int32)
    loss2 = jax.block_until_ready(seg_loss(out2, y2, tile_p=128,
                                           num_core_split=2))
    ref2 = jax.block_until_ready(_seg_loss_ref(out2, y2))
    assert jnp.allclose(loss2, ref2, rtol=2e-3, atol=2e-3), (loss2, ref2)

    # Case 3: bf16 logits (halved HBM traffic), f32 accumulation in-kernel.
    out3 = out.astype(jnp.bfloat16)
    loss3 = jax.block_until_ready(seg_loss(out3, y))
    ref3 = jax.block_until_ready(_seg_loss_ref(out3, y))
    assert jnp.allclose(loss3, ref3, rtol=5e-3, atol=5e-3), (loss3, ref3)

    print("KERNEL_OK")
</pallas_src>

<mosaic_0001>
module attributes {stable_mosaic.version = 11 : i64} {
  func.func @_segloss_kernel(%arg0: i32, %arg1: i32, %arg2: i32, %arg3: memref<1x4x256xf32, #tpu.memory_space<vmem>>, %arg4: memref<1x1x256xi32, #tpu.memory_space<vmem>>, %arg5: memref<1x1x1xf32, #tpu.memory_space<vmem>>, %arg6: memref<1x4x1xf32, #tpu.memory_space<vmem>>, %arg7: memref<1x4x1xf32, #tpu.memory_space<vmem>>, %arg8: memref<1x256xf32, #tpu.memory_space<vmem>>, %arg9: memref<4x256xf32, #tpu.memory_space<vmem>>, %arg10: memref<4x256xf32, #tpu.memory_space<vmem>>) attributes {dimension_semantics = [#tpu.dimension_semantics<parallel>, #tpu.dimension_semantics<arbitrary>, #tpu.dimension_semantics<arbitrary>], iteration_bounds = array<i64: 1, 2, 1>, scalar_prefetch = 0 : i64, scratch_operands = 3 : i64, tpu.core_type = #tpu.core_type<tc>, window_params = [{transform_indices = @transform_0, window_bounds = array<i64: 1, 4, 256>}, {transform_indices = @transform_1, window_bounds = array<i64: 1, 1, 256>}, {transform_indices = @transform_2, window_bounds = array<i64: 1, 1, 1>}, {transform_indices = @transform_3, window_bounds = array<i64: 1, 4, 1>}, {transform_indices = @transform_4, window_bounds = array<i64: 1, 4, 1>}]} {
    %c0_i32 = arith.constant 0 : i32
    %0 = arith.cmpi eq, %arg1, %c0_i32 : i32
    %c0_i32_0 = arith.constant 0 : i32
    %1 = arith.cmpi eq, %arg2, %c0_i32_0 : i32
    %2 = arith.andi %0, %1 : i1
    %c1_i32 = arith.constant 1 : i32
    %3 = arith.cmpi eq, %arg1, %c1_i32 : i32
    %c0_i32_1 = arith.constant 0 : i32
    %4 = arith.cmpi eq, %arg2, %c0_i32_1 : i32
    %5 = arith.andi %3, %4 : i1
    %6 = arith.extui %2 : i1 to i32
    %c0_i32_2 = arith.constant 0 : i32
    %7 = arith.cmpi ne, %6, %c0_i32_2 : i32
    scf.if %7 {
      %cst_29 = arith.constant 0.000000e+00 : f32
      %59 = vector.broadcast %cst_29 : f32 to vector<1x256xf32>
      %c0_30 = arith.constant 0 : index
      %c0_31 = arith.constant 0 : index
      %60 = vector.load %arg8[%c0_30, %c0_31] : memref<1x256xf32, #tpu.memory_space<vmem>>, vector<1x256xf32>
      tpu.vector_store %arg8[%c0_30, %c0_31], %59 {strides = array<i32>} : memref<1x256xf32, #tpu.memory_space<vmem>>, vector<1x256xf32>,
      %cst_32 = arith.constant 0.000000e+00 : f32
      %61 = vector.broadcast %cst_32 : f32 to vector<4x256xf32>
      %c0_33 = arith.constant 0 : index
      %c0_34 = arith.constant 0 : index
      %62 = vector.load %arg9[%c0_33, %c0_34] : memref<4x256xf32, #tpu.memory_space<vmem>>, vector<4x256xf32>
      tpu.vector_store %arg9[%c0_33, %c0_34], %61 {strides = array<i32>} : memref<4x256xf32, #tpu.memory_space<vmem>>, vector<4x256xf32>,
      %cst_35 = arith.constant 0.000000e+00 : f32
      %63 = vector.broadcast %cst_35 : f32 to vector<4x256xf32>
      %c0_36 = arith.constant 0 : index
      %c0_37 = arith.constant 0 : index
      %64 = vector.load %arg10[%c0_36, %c0_37] : memref<4x256xf32, #tpu.memory_space<vmem>>, vector<4x256xf32>
      tpu.vector_store %arg10[%c0_36, %c0_37], %63 {strides = array<i32>} : memref<4x256xf32, #tpu.memory_space<vmem>>, vector<4x256xf32>,
    } else {
    }
    %c0 = arith.constant 0 : index
    %c0_3 = arith.constant 0 : index
    %c0_4 = arith.constant 0 : index
    %8 = vector.load %arg3[%c0, %c0_3, %c0_4] : memref<1x4x256xf32, #tpu.memory_space<vmem>>, vector<1x4x256xf32>
    %9 = vector.shape_cast %8 : vector<1x4x256xf32> to vector<4x256xf32>
    %c0_5 = arith.constant 0 : index
    %c0_6 = arith.constant 0 : index
    %c0_7 = arith.constant 0 : index
    %10 = vector.load %arg4[%c0_5, %c0_6, %c0_7] : memref<1x1x256xi32, #tpu.memory_space<vmem>>, vector<1x1x256xi32>
    %11 = vector.shape_cast %10 : vector<1x1x256xi32> to vector<1x256xi32>
    %c1_i32_8 = arith.constant 1 : i32
    %12 = arith.muli %arg0, %c1_i32_8 : i32
    %13 = arith.addi %12, %arg2 : i32
    %c256_i32 = arith.constant 256 : i32
    %14 = arith.muli %13, %c256_i32 : i32
    %15 = tpu.iota {dimensions = array<i32: 1>} : vector<1x256xi32>
    %16 = vector.broadcast %14 : i32 to vector<1x256xi32>
    %17 = arith.addi %16, %15 : vector<1x256xi32>
    %c256_i32_9 = arith.constant 256 : i32
    %18 = vector.broadcast %c256_i32_9 : i32 to vector<1x256xi32>
    %19 = arith.cmpi slt, %17, %18 : vector<1x256xi32>
    %20 = tpu.iota {dimensions = array<i32: 0>} : vector<4x256xi32>
    %21 = vector.broadcast %11 : vector<1x256xi32> to vector<4x256xi32>
    %22 = arith.cmpi eq, %20, %21 : vector<4x256xi32>
    %cst = arith.constant dense<0xFF800000> : vector<256xf32>
    %23 = vector.multi_reduction <maximumf>, %9, %cst [0] : vector<4x256xf32> to vector<256xf32>
    %24 = vector.shape_cast %23 : vector<256xf32> to vector<1x256xf32>
    %25 = vector.broadcast %24 : vector<1x256xf32> to vector<4x256xf32>
    %26 = arith.subf %9, %25 : vector<4x256xf32>
    %27 = math.exp %26 : vector<4x256xf32>
    %cst_10 = arith.constant dense<0.000000e+00> : vector<256xf32>
    %28 = vector.multi_reduction <add>, %27, %cst_10 [0] : vector<4x256xf32> to vector<256xf32>
    %29 = vector.shape_cast %28 : vector<256xf32> to vector<1x256xf32>
    %30 = math.log %29 : vector<1x256xf32>
    %31 = arith.addf %24, %30 : vector<1x256xf32>
    %32 = tpu.reciprocal %29 {approx = true} : vector<1x256xf32> -> vector<1x256xf32>
    %33 = vector.broadcast %32 : vector<1x256xf32> to vector<4x256xf32>
    %34 = arith.mulf %27, %33 : vector<4x256xf32>
    %cst_11 = arith.constant 0.000000e+00 : f32
    %35 = vector.shape_cast %19 : vector<1x256xi1> to vector<1x256xi1>
    %36 = vector.broadcast %35 : vector<1x256xi1> to vector<4x256xi1>
    %37 = vector.broadcast %cst_11 : f32 to vector<4x256xf32>
    %38 = arith.select %36, %34, %37 : vector<4x256xi1>, vector<4x256xf32>
    %cst_12 = arith.constant 0.000000e+00 : f32
    %39 = vector.broadcast %cst_12 : f32 to vector<4x256xf32>
    %40 = arith.select %22, %9, %39 : vector<4x256xi1>, vector<4x256xf32>
    %cst_13 = arith.constant dense<0.000000e+00> : vector<256xf32>
    %41 = vector.multi_reduction <add>, %40, %cst_13 [0] : vector<4x256xf32> to vector<256xf32>
    %42 = vector.shape_cast %41 : vector<256xf32> to vector<1x256xf32>
    %43 = arith.subf %31, %42 : vector<1x256xf32>
    %c0_14 = arith.constant 0 : index
    %c0_15 = arith.constant 0 : index
    %44 = vector.load %arg8[%c0_14, %c0_15] : memref<1x256xf32, #tpu.memory_space<vmem>>, vector<1x256xf32>
    %cst_16 = arith.constant 0.000000e+00 : f32
    %45 = vector.broadcast %cst_16 : f32 to vector<1x256xf32>
    %46 = arith.select %19, %43, %45 : vector<1x256xi1>, vector<1x256xf32>
    %47 = arith.addf %44, %46 : vector<1x256xf32>
    %c0_17 = arith.constant 0 : index
    %c0_18 = arith.constant 0 : index
    %48 = vector.load %arg8[%c0_17, %c0_18] : memref<1x256xf32, #tpu.memory_space<vmem>>, vector<1x256xf32>
    tpu.vector_store %arg8[%c0_17, %c0_18], %47 {strides = array<i32>} : memref<1x256xf32, #tpu.memory_space<vmem>>, vector<1x256xf32>,
    %c0_19 = arith.constant 0 : index
    %c0_20 = arith.constant 0 : index
    %49 = vector.load %arg9[%c0_19, %c0_20] : memref<4x256xf32, #tpu.memory_space<vmem>>, vector<4x256xf32>
    %cst_21 = arith.constant 0.000000e+00 : f32
    %50 = vector.broadcast %cst_21 : f32 to vector<4x256xf32>
    %51 = arith.select %22, %38, %50 : vector<4x256xi1>, vector<4x256xf32>
    %52 = arith.addf %49, %51 : vector<4x256xf32>
    %c0_22 = arith.constant 0 : index
    %c0_23 = arith.constant 0 : index
    %53 = vector.load %arg9[%c0_22, %c0_23] : memref<4x256xf32, #tpu.memory_space<vmem>>, vector<4x256xf32>
    tpu.vector_store %arg9[%c0_22, %c0_23], %52 {strides = array<i32>} : memref<4x256xf32, #tpu.memory_space<vmem>>, vector<4x256xf32>,
    %c0_24 = arith.constant 0 : index
    %c0_25 = arith.constant 0 : index
    %54 = vector.load %arg10[%c0_24, %c0_25] : memref<4x256xf32, #tpu.memory_space<vmem>>, vector<4x256xf32>
    %55 = arith.addf %54, %38 : vector<4x256xf32>
    %c0_26 = arith.constant 0 : index
    %c0_27 = arith.constant 0 : index
    %56 = vector.load %arg10[%c0_26, %c0_27] : memref<4x256xf32, #tpu.memory_space<vmem>>, vector<4x256xf32>
    tpu.vector_store %arg10[%c0_26, %c0_27], %55 {strides = array<i32>} : memref<4x256xf32, #tpu.memory_space<vmem>>, vector<4x256xf32>,
    %57 = arith.extui %5 : i1 to i32
    %c0_i32_28 = arith.constant 0 : i32
    %58 = arith.cmpi ne, %57, %c0_i32_28 : i32
    scf.if %58 {
      %c0_29 = arith.constant 0 : index
      %c0_30 = arith.constant 0 : index
      %59 = vector.load %arg8[%c0_29, %c0_30] : memref<1x256xf32, #tpu.memory_space<vmem>>, vector<1x256xf32>
      %cst_31 = arith.constant dense<0.000000e+00> : vector<1xf32>
      %60 = vector.multi_reduction <add>, %59, %cst_31 [1] : vector<1x256xf32> to vector<1xf32>
      %61 = vector.shape_cast %60 : vector<1xf32> to vector<1x1xf32>
      %c0_32 = arith.constant 0 : index
      %c0_33 = arith.constant 0 : index
      %c0_34 = arith.constant 0 : index
      %62 = vector.load %arg5[%c0_32, %c0_33, %c0_34] : memref<1x1x1xf32, #tpu.memory_space<vmem>>, vector<1x1x1xf32>
      %63 = vector.shape_cast %62 : vector<1x1x1xf32> to vector<1x1xf32>
      %64 = vector.shape_cast %61 : vector<1x1xf32> to vector<1x1x1xf32>
      tpu.vector_store %arg5[%c0_32, %c0_33, %c0_34], %64 {strides = array<i32>} : memref<1x1x1xf32, #tpu.memory_space<vmem>>, vector<1x1x1xf32>,
      %c0_35 = arith.constant 0 : index
      %c0_36 = arith.constant 0 : index
      %65 = vector.load %arg9[%c0_35, %c0_36] : memref<4x256xf32, #tpu.memory_space<vmem>>, vector<4x256xf32>
      %cst_37 = arith.constant dense<0.000000e+00> : vector<4xf32>
      %66 = vector.multi_reduction <add>, %65, %cst_37 [1] : vector<4x256xf32> to vector<4xf32>
      %67 = vector.shape_cast %66 : vector<4xf32> to vector<4x1xf32>
      %c0_38 = arith.constant 0 : index
      %c0_39 = arith.constant 0 : index
      %c0_40 = arith.constant 0 : index
      %68 = vector.load %arg6[%c0_38, %c0_39, %c0_40] : memref<1x4x1xf32, #tpu.memory_space<vmem>>, vector<1x4x1xf32>
      %69 = vector.shape_cast %68 : vector<1x4x1xf32> to vector<4x1xf32>
      %70 = vector.shape_cast %67 : vector<4x1xf32> to vector<1x4x1xf32>
      tpu.vector_store %arg6[%c0_38, %c0_39, %c0_40], %70 {strides = array<i32>} : memref<1x4x1xf32, #tpu.memory_space<vmem>>, vector<1x4x1xf32>,
      %c0_41 = arith.constant 0 : index
      %c0_42 = arith.constant 0 : index
      %71 = vector.load %arg10[%c0_41, %c0_42] : memref<4x256xf32, #tpu.memory_space<vmem>>, vector<4x256xf32>
      %cst_43 = arith.constant dense<0.000000e+00> : vector<4xf32>
      %72 = vector.multi_reduction <add>, %71, %cst_43 [1] : vector<4x256xf32> to vector<4xf32>
      %73 = vector.shape_cast %72 : vector<4xf32> to vector<4x1xf32>
      %c0_44 = arith.constant 0 : index
      %c0_45 = arith.constant 0 : index
      %c0_46 = arith.constant 0 : index
      %74 = vector.load %arg7[%c0_44, %c0_45, %c0_46] : memref<1x4x1xf32, #tpu.memory_space<vmem>>, vector<1x4x1xf32>
      %75 = vector.shape_cast %74 : vector<1x4x1xf32> to vector<4x1xf32>
      %76 = vector.shape_cast %73 : vector<4x1xf32> to vector<1x4x1xf32>
      tpu.vector_store %arg7[%c0_44, %c0_45, %c0_46], %76 {strides = array<i32>} : memref<1x4x1xf32, #tpu.memory_space<vmem>>, vector<1x4x1xf32>,
    } else {
    }
    return
  }
  func.func @transform_0(%arg0: i32, %arg1: i32, %arg2: i32) -> (i32, i32, i32) {
    %c1_i32 = arith.constant 1 : i32
    %0 = arith.muli %arg0, %c1_i32 : i32
    %1 = arith.addi %0, %arg2 : i32
    %c0_i32 = arith.constant 0 : i32
    %2 = arith.minsi %1, %c0_i32 : i32
    %c0_i32_0 = arith.constant 0 : i32
    %c0_i32_1 = arith.constant 0 : i32
    return %arg1, %c0_i32_0, %2 : i32, i32, i32
  }
  func.func @transform_1(%arg0: i32, %arg1: i32, %arg2: i32) -> (i32, i32, i32) {
    %c1_i32 = arith.constant 1 : i32
    %0 = arith.muli %arg0, %c1_i32 : i32
    %1 = arith.addi %0, %arg2 : i32
    %c0_i32 = arith.constant 0 : i32
    %2 = arith.minsi %1, %c0_i32 : i32
    %c0_i32_0 = arith.constant 0 : i32
    %c0_i32_1 = arith.constant 0 : i32
    return %arg1, %c0_i32_0, %2 : i32, i32, i32
  }
  func.func @transform_2(%arg0: i32, %arg1: i32, %arg2: i32) -> (i32, i32, i32) {
    %c0_i32 = arith.constant 0 : i32
    %c0_i32_0 = arith.constant 0 : i32
    %c0_i32_1 = arith.constant 0 : i32
    return %arg0, %c0_i32, %c0_i32_0 : i32, i32, i32
  }
  func.func @transform_3(%arg0: i32, %arg1: i32, %arg2: i32) -> (i32, i32, i32) {
    %c0_i32 = arith.constant 0 : i32
    %c0_i32_0 = arith.constant 0 : i32
    %c0_i32_1 = arith.constant 0 : i32
    return %arg0, %c0_i32, %c0_i32_0 : i32, i32, i32
  }
  func.func @transform_4(%arg0: i32, %arg1: i32, %arg2: i32) -> (i32, i32, i32) {
    %c0_i32 = arith.constant 0 : i32
    %c0_i32_0 = arith.constant 0 : i32
    %c0_i32_1 = arith.constant 0 : i32
    return %arg0, %c0_i32, %c0_i32_0 : i32, i32, i32
  }
}

</mosaic_0001>

<bundles_post_ra>
// kernel: tpu_custom_call.1
= control target key start
LH: loop header
LB: loop body
LE: loop exit
PB: predicated region body
PF: predicated region fallthrough
CT: control target
= control target key end

     0   :  { %10 = vsyncpa [#allocation6], 0  ;;  %s1118_s0 = inlined_call_operand.hbm [shape: f32[2,4,256], index: 0, kind: input, shape index: {}]   ;;  %s1119_s1 = inlined_call_operand.hbm [shape: s32[2,1,256], index: 1, kind: input, shape index: {}]   ;;  %s1120_s2 = inlined_call_operand.hbm [shape: f32[1,1,1], index: 2, kind: output, shape index: {0}]   ;;  %s1121_s3 = inlined_call_operand.vmem [shape: f32[1,4,1], index: 3, kind: output, shape index: {1}]   ;;  %s1122_s4 = inlined_call_operand.vmem [shape: f32[1,4,1], index: 4, kind: output, shape index: {2}]  }
   0x1   :  { %12 = vsyncpa [#allocation6 + $0x1], 0 }
   0x2   :  { %13 = vsyncpa [#allocation9], 0 }
   0x3   :  { %15 = vsyncpa [#allocation9 + $0x1], 0 }
   0x4   :  { %16 = vsyncpa [#allocation7], 0  ;;  %s961_s15 = smov 0   ;;  %s963_s16 = smov 0  }
   0x5   :  { %s965_s17 = smov 0   ;;  %s967_s18 = smov 0  }
   0x6   :  { %s969_s19 = smov 0   ;;  %s971_s20 = smov 0  }
   0x7 LB: > { %s686_s21 = sadd.s32 4294967295, %s932_s20   ;;  %s37_s22 = sadd.s32 1, %s928_s19  ;;  %s932_s20 = sphi %s971_s20, %s22_s20   ;;  %s928_s19 = sphi %s969_s19, %s1134_s19   ;;  %s924_s18 = sphi %s967_s18, %s1133_s18   ;;  %s920_s17 = sphi %s965_s17, %s1132_s17   ;;  %s916_s16 = sphi %s963_s16, %s1131_s16   ;;  %s912_s15 = sphi %s961_s15, %s1130_s15  }
   0x8   : > { %p39_p0 = scmp.ge.s32.totalorder %s37_s22, 2  ;;  %s56_s23 = sadd.s32 1, %s920_s17 }
   0x9   : > { %p63_p1 = scmp.ne.s32.totalorder %s920_s17, %s916_s16  ;;  %p64_p2 = scmp.eq.s32.totalorder %s932_s20, 0 }
   0xa   : > { %s1136_s22 = smov (%p39_p0, %s37_s22), 0  ;;  %p69_p4 = scmp.ne.s32.totalorder %s916_s16, %s912_s15 }
   0xb   : > { %p997_p3 = por %p64_p2, %p63_p1  ;;  %s51_s25 = ssub.s32 %s928_s19, %s1136_s22 }
   0xc   : > { %p70_p5 = scmp.eq.s32.totalorder %s686_s21, 0  ;;  %p54_p6 = scmp.eq.s32.totalorder %s51_s25, 0 }
   0xd   : > { %p723_p8 = scmp.lt.s32.totalorder %s932_s20, 2  ;;  %s205_s28 = sand.u32 1, %s920_s17  }
   0xe   : > { %p1006_p7 = por %p70_p5, %p69_p4  ;;  %s705_s29 = sshll.u32 %s928_s19, 3 }
   0xf   : > { %s1012_s27 = scalar_select %p54_p6, %s920_s17, %s56_s23  }
  0x10   : > { %s689_s30 = sshll.u32 %s205_s28, 3  ;;  %s219_s7 = scalar_lea.hbm %s1118_s0, %s705_s29 }
  0x11   : > { %s221_s8 = sshll.u32 %s219_s7, 4  ;;  %s209_s9 = scalar_lea.vmem [#allocation5], %s689_s30  ;;  %s222_s8 = int_to_ptr.hbm [resolvable:$true] %s221_s8 }
  0x12   : > { %s223_s10 = sshll.u32 %s209_s9, 4  ;;  %p1021_p9 = pnand %p723_p8, %p997_p3  ;;  %s224_s10 = int_to_ptr.vmem [resolvable:$true] %s223_s10 }
  0x13   : > { %p694_p10 = scmp.ge.s32.totalorder %s932_s20, 1  ;;  %p252_p11 = scmp.lt.s32.totalorder %s932_s20, 3 }
  0x14   : > { %s692_s12 = sshll.u32 %s205_s28, 1  ;;  %s206_s13 = scalar_lea.sflag [#allocation6], %s205_s28 }
  0x15   : > { %719 = dma.hbm_to_vmem [thread:$0]  (!%p1021_p9), %s222_s8, 128, %s224_s10, %s206_s13  }
  0x16   : > { %p253_p12 = pnand %p694_p10, %p252_p11  ;;  %s693_s14 = sshll.u32 %s928_s19, 1 }
  0x17   : > { %s234_s15 = scalar_lea.vmem [#allocation8], %s692_s12  ;;  %s243_s24 = scalar_lea.hbm %s1119_s1, %s693_s14 }
  0x18   : > { %s247_s23 = sshll.u32 %s234_s15, 4  ;;  %s245_s30 = sshll.u32 %s243_s24, 4  ;;  %s248_s23 = int_to_ptr.vmem [resolvable:$true] %s247_s23  ;;  %s246_s30 = int_to_ptr.hbm [resolvable:$true] %s245_s30 }
  0x19   : > { %s231_s5 = scalar_lea.sflag [#allocation9], %s205_s28  ;;  %256 = sbr.rel (%p253_p12) target bundleno = 291 (0x123), region = 28 }
  0x1a   : > { %722 = dma.hbm_to_vmem [thread:$0]  (!%p1021_p9), %s246_s30, 32, %s248_s23, %s231_s5  }
  0x1b   : > { %s258_s6 = sand.u32 (!%p253_p12), 1, %s916_s16  }
  0x1c   : > { %s695_s7 = sshll.u32 (!%p253_p12), %s258_s6, 3  ;;  %s259_s8 = scalar_lea.sflag (!%p253_p12), [#allocation6], %s258_s6 }
  0x1d   : > { %s262_s9 = scalar_lea.vmem (!%p253_p12), [#allocation5], %s695_s7 }
  0x1e   : > { %899 = dma.done.wait (%p1006_p7), %s259_s8, 128  }
  0x1f   : > { %901 = vsyncadd (%p1006_p7), %s259_s8, 4294967168  ;;  %s696_s10 = sshll.u32 %s258_s6, 1  ;;  %s269_s12 = scalar_lea.sflag [#allocation9], %s258_s6 }
  0x20   : > { %s1040_s13 = scalar_lea.vmem [#allocation8], %s696_s10 }
  0x21   : > { %903 = dma.done.wait (%p1006_p7), %s269_s12, 32  }
  0x22   : > { %905 = vsyncadd (%p1006_p7), %s269_s12, 4294967264  ;;  %p322_p13 = scmp.eq.s32.totalorder %s924_s18, 0  ;;  %p326_p0 = scmp.eq.s32.totalorder %s924_s18, 1 }
  0x23   : > { %v331_v0 = vlaneseq (%p322_p13)  ;;  %v934_v1 = vmov (%p322_p13), 0.0  }
  0x24   : > { %330 = sbr.rel (!%p322_p13) target bundleno = 41 (0x29), region = 40  ;;  %336 = vst [vmem:[#allocation3] sm:$0xff] (%p322_p13), %v934_v1 }
  0x25   : > { %vm333_vm0 = vcmp.lt.s32.totalorder (%p322_p13), %v331_v0, 256  ;;  %337 = vst [vmem:[#allocation4] sm:$0xff] (%p322_p13), %v934_v1 }
  0x26   : > { %335 = vst.msk [vmem:[#allocation2] sm:$0x3] (%p322_p13), %vm333_vm0, %v934_v1 }
  0x29 PF: > { %v338_v2 = vld [vmem:[%s262_s9] sm:$0xff]  ;;  %vm362_vm1 = vcmask 1043456   ;;  %v350_v44 = vlaneseq  ;;  %v339_v46 = vld [vmem:[%s1040_s13] sm:$0x3]  ;;  %vm460_vm4 = vcmask 1040384   ;;  %vm500_vm6 = vcmask (%p326_p0), 0  }
  0x2a   : > { %357 = vst [vmem:[#allocation1] ss:$2 sm:$0xff] %v338_v2  ;;  %v353_v48 = vperm.slane %v339_v46, 1  ;;  %v352_v49 = vperm.slane %v339_v46, 0  ;;  %vm514_vm7 = vcmask (%p326_p0), 3072  }
  0x2b   : > { %v351_v47 = vshrl.u32 %v350_v44, 7  ;;  %v469_v57 = vld [vmem:[#allocation3] sm:$0xff]  ;;  %vm466_vm5 = vcmp.lt.s32.totalorder %v350_v44, 256 }
  0x2c   : > { %v479_v54 = vld [vmem:[#allocation4] sm:$0xff] }
  0x2d   : > { %vm1061_vm2 = vcmp.eq.s32.totalorder %v351_v47, %v353_v48  ;;  %vm1065_vm3 = vcmp.eq.s32.totalorder %v351_v47, %v352_v49 }
  0x31   : > { %v358_v3 = vld.sshfl [vmem:[#allocation1] sm:$0xff pattern:$0x75316420]  ;;  %v359_v4 = vld.sshfl [vmem:[#allocation1 + $0x8] sm:$0xff pattern:$0x75316420] }
  0x32   : > { %v363_v5 = vsel %vm362_vm1, %v358_v3, -inf  ;;  %v370_v6 = vsel %vm362_vm1, %v359_v4, -inf }
  0x33   : > { %v364_v7 = vrot.slane %v363_v5, 4  ;;  %v371_v8 = vrot.slane %v370_v6, 4 }
  0x35   : > { %v365_v9 = vmax.f32 %v363_v5, %v364_v7  ;;  %v372_v10 = vmax.f32 %v370_v6, %v371_v8 }
  0x37   : > { %v366_v11 = vrot.slane %v365_v9, 2  ;;  %v373_v12 = vrot.slane %v372_v10, 2 }
  0x39   : > { %v367_v13 = vmax.f32 %v365_v9, %v366_v11  ;;  %v374_v14 = vmax.f32 %v372_v10, %v373_v12 }
  0x3b   : > { %v368_v15 = vrot.slane %v367_v13, 1  ;;  %v375_v16 = vrot.slane %v374_v14, 1 }
  0x3d   : > { %v1050_v17 = vmax.f32 %v374_v14, %v375_v16  ;;  %v1052_v18 = vmax.f32 %v367_v13, %v368_v15 }
  0x3f   : > { %v379_v19 = vrot.slane %v1050_v17, 4 }
  0x41   : > { %v380_v20 = vsel %vm362_vm1, %v1052_v18, %v379_v19 }
  0x42   : > { %v382_v21 = vsub.f32 %v338_v2, %v380_v20 }
  0x44   : > { %v383_v22 = vmul.f32 1.442695, %v382_v21 }
  0x46   : > { %776 = vpow2.f32 %v383_v22 }
  0x4c   : > { %v777_v23 = vpop.eup %776 }
  0x4d   : > { %386 = vst [vmem:[#allocation1] ss:$2 sm:$0xff] %v777_v23 }
  0x54   : > { %v387_v24 = vld.sshfl [vmem:[#allocation1] sm:$0xff pattern:$0x75316420]  ;;  %v388_v25 = vld.sshfl [vmem:[#allocation1 + $0x8] sm:$0xff pattern:$0x75316420] }
  0x55   : > { %v391_v26 = vsel %vm362_vm1, %v387_v24, 0.0  ;;  %v398_v27 = vsel %vm362_vm1, %v388_v25, 0.0 }
  0x56   : > { %v392_v28 = vrot.slane %v391_v26, 4  ;;  %v399_v29 = vrot.slane %v398_v27, 4 }
  0x58   : > { %v393_v30 = vadd.f32 %v392_v28, %v391_v26  ;;  %v400_v31 = vadd.f32 %v399_v29, %v398_v27  ;;  %v454_v28 = vld [vmem:[#allocation2] sm:$0x3] }
  0x5a   : > { %v394_v32 = vrot.slane %v393_v30, 2  ;;  %v401_v33 = vrot.slane %v400_v31, 2 }
  0x5c   : > { %v395_v34 = vadd.f32 %v394_v32, %v393_v30  ;;  %v402_v35 = vadd.f32 %v401_v33, %v400_v31 }
  0x5e   : > { %v396_v36 = vrot.slane %v395_v34, 1  ;;  %v403_v37 = vrot.slane %v402_v35, 1 }
  0x60   : > { %v404_v38 = vadd.f32 %v403_v37, %v402_v35  ;;  %v397_v39 = vadd.f32 %v396_v36, %v395_v34 }
  0x62   : > { %778 = vrcp.f32 %v404_v38 }
  0x63   : > { %780 = vrcp.f32 %v397_v39 }
  0x64   : > { %782 = vlog2.f32 %v404_v38 }
  0x65   : > { %784 = vlog2.f32 %v397_v39 }
  0x68   : > { %v779_v40 = vpop.eup %778 }
  0x69   : > { %v415_v41 = vrot.slane %v779_v40, 4  ;;  %v781_v42 = vpop.eup %780 }
  0x6a   : > { %v783_v10 = vpop.eup %782 }
  0x6b   : > { %v416_v43 = vsel %vm362_vm1, %v781_v42, %v415_v41  ;;  %v785_v13 = vpop.eup %784  ;;  %v408_v15 = vmul.f32 0.6931472, %v783_v10 }
  0x6c   : > { %v418_v45 = vmul.f32 %v777_v23, %v416_v43  ;;  %v406_v19 = vmul.f32 0.6931472, %v785_v13 }
  0x6d   : > { %v410_v22 = vadd.f32 %v408_v15, %v1050_v17 }
  0x6e   : > { %424 = vst [vmem:[#allocation1] ss:$2 sm:$0xff] %v418_v45  ;;  %v409_v25 = vadd.f32 %v406_v19, %v1052_v18 }
  0x75   : > { %v425_v51 = vld.sshfl [vmem:[#allocation1] sm:$0xff pattern:$0x75316420]  ;;  %v426_v52 = vld.sshfl [vmem:[#allocation1 + $0x8] sm:$0xff pattern:$0x75316420] }
  0x76   : > { %431 = vst [vmem:[#allocation1] ss:$2 sm:$0xff] %v338_v2  ;;  %v482_v55 = vrot.slane %v426_v52, 4  ;;  %v471_v56 = vsel %vm1061_vm2, %v426_v52, 0.0  ;;  %v470_v60 = vsel %vm1065_vm3, %v425_v51, 0.0 }
  0x77   : > { %v474_v58 = vrot.slane %v471_v56, 4 }
  0x78   : > { %v483_v59 = vsel %vm362_vm1, %v425_v51, %v482_v55 }
  0x79   : > { %v485_v61 = vadd.f32 %v483_v59, %v479_v54  ;;  %v475_v62 = vsel %vm362_vm1, %v470_v60, %v474_v58 }
  0x7a   : > { %v477_v63 = vadd.f32 %v475_v62, %v469_v57 }
  0x7b   : > { %486 = vst [vmem:[#allocation4] sm:$0xff] %v485_v61 }
  0x7c   : > { %478 = vst [vmem:[#allocation3] sm:$0xff] %v477_v63 }
  0x7d   : > { %v432_v0 = vld.sshfl [vmem:[#allocation1] sm:$0xff pattern:$0x75316420]  ;;  %v433_v1 = vld.sshfl [vmem:[#allocation1 + $0x8] sm:$0xff pattern:$0x75316420] }
  0x7e   : > { %v436_v2 = vsel %vm1065_vm3, %v432_v0, 0.0  ;;  %v437_v3 = vsel %vm1061_vm2, %v433_v1, 0.0 }
  0x7f   : > { %v438_v4 = vsel %vm362_vm1, %v436_v2, 0.0  ;;  %v445_v5 = vsel %vm362_vm1, %v437_v3, 0.0 }
  0x80   : > { %v439_v6 = vrot.slane %v438_v4, 4  ;;  %v446_v7 = vrot.slane %v445_v5, 4 }
  0x82   : > { %v440_v8 = vadd.f32 %v439_v6, %v438_v4  ;;  %v447_v9 = vadd.f32 %v446_v7, %v445_v5  ;;  %v516_v37 = vld [vmem:[#allocation4] sm:$0xff] (%p326_p0) }
  0x83   : > { %v502_v33 = vld [vmem:[#allocation3] sm:$0xff] (%p326_p0) }
  0x84   : > { %v441_v11 = vrot.slane %v440_v8, 2  ;;  %v448_v12 = vrot.slane %v447_v9, 2  ;;  %504 = vst [vmem:[#allocation1] ss:$2 sm:$0xff] (%p326_p0), %v502_v33 }
  0x86   : > { %v442_v14 = vadd.f32 %v441_v11, %v440_v8  ;;  %v449_v16 = vadd.f32 %v448_v12, %v447_v9 }
  0x88   : > { %v443_v20 = vrot.slane %v442_v14, 1  ;;  %v450_v21 = vrot.slane %v449_v16, 1 }
  0x8a   : > { %v444_v23 = vadd.f32 %v443_v20, %v442_v14  ;;  %v451_v24 = vadd.f32 %v450_v21, %v449_v16 }
  0x8b   : > { %v505_v38 = vld.sshfl [vmem:[#allocation1] sm:$0xff pattern:$0x75316420] (%p326_p0)  ;;  %v506_v39 = vld.sshfl [vmem:[#allocation1 + $0x8] sm:$0xff pattern:$0x75316420] (%p326_p0) }
  0x8c   : > { %v453_v26 = vsub.f32 %v410_v22, %v451_v24  ;;  %v452_v27 = vsub.f32 %v409_v25, %v444_v23  ;;  %518 = vst [vmem:[#allocation1] ss:$2 sm:$0xff] (%p326_p0), %v516_v37  ;;  %v509_v40 = vsel (%p326_p0), %vm362_vm1, %v505_v38, 0.0  ;;  %v510_v41 = vsel (%p326_p0), %vm362_vm1, %v506_v39, 0.0 }
  0x8d   : > { %v511_v42 = vadd.f32 (%p326_p0), %v510_v41, %v509_v40 }
  0x8e   : > { %v459_v29 = vrot.slane %v453_v26, 7 }
  0x8f   : > { %488 = sbr.rel (!%p326_p0) target bundleno = 285 (0x11d), region = 44 }
  0x90   : > { %v461_v30 = vsel %vm460_vm4, %v452_v27, %v459_v29 }
  0x91   : > { %v463_v31 = vadd.f32 %v461_v30, %v454_v28 }
  0x93   : > { %468 = vst.msk [vmem:[#allocation2] sm:$0x3] %vm466_vm5, %v463_v31  ;;  %v519_v43 = vld.sshfl [vmem:[#allocation1] sm:$0xff pattern:$0x75316420] (%p326_p0) }
  0x94   : > { %v520_v44 = vld.sshfl [vmem:[#allocation1 + $0x8] sm:$0xff pattern:$0x75316420]  ;;  %v523_v45 = vsel %vm362_vm1, %v519_v43, 0.0 }
  0x95   : > { %v524_v46 = vsel %vm362_vm1, %v520_v44, 0.0 }
  0x96   : > { %v525_v47 = vadd.f32 %v524_v46, %v523_v45 }
  0x98   : > { %526 = vadd.xlane.f32.xlu1 %v525_v47 }
  0x9a   : > { %v489_v32 = vld [vmem:[#allocation2] sm:$0x3] }
  0x9b   : > { %v491_v34 = vperm.slane %v489_v32, 0  ;;  %v492_v17 = vperm.slane %v489_v32, 1 }
  0x9d   : > { %v495_v35 = vsel %vm460_vm4, %v491_v34, 0.0  ;;  %v496_v36 = vsel %vm460_vm4, %v492_v17, 0.0 }
  0x9e   : > { %v497_v18 = vadd.f32 %v496_v36, %v495_v35 }
  0xa0   : > { %498 = vadd.xlane.f32.xlu0 %v497_v18 }
  0xa8   : > { %512 = vadd.xlane.f32.xlu0 %v511_v42 }
 0x10b   : > { %v527_v50 = vpop.xlane.xlu1 %526 }
 0x10c   : > { %528 = vst.msk [vmem:[%s1122_s4] sm:$0xf] %vm514_vm7, %v527_v50 }
 0x113   : > { %v499_v48 = vpop.xlane.xlu0 %498 }
 0x114   : > { %501 = vst.msk [vmem:[#allocation10] sm:$0x1] %vm500_vm6, %v499_v48 }
 0x11b   : > { %v513_v49 = vpop.xlane.xlu0 %512 }
 0x11c   : > { %515 = vst.msk [vmem:[%s1121_s3] sm:$0xf] %vm514_vm7, %v513_v49 }
 0x11d PF: > { %p724_p1 = scmp.eq.s32.totalorder %s686_s21, 1  ;;  %s546_s23 = sshll.u32 %s1120_s2, 4  ;;  %s547_s23 = int_to_ptr.hbm [resolvable:$true] %s546_s23 }
 0x11e   : > { %s935_s25 = smov [#allocation10]  }
 0x11f   : > { %s544_s29 = sshll.u32 %s935_s25, 4  ;;  %s545_s29 = int_to_ptr.vmem [resolvable:$true] %s544_s29 }
 0x120   : > { %713 = dma.vmem_to_hbm [thread:$0]  (%p724_p1), %s545_s29, 16, %s547_s23, [#allocation7]  }
 0x121   : > { %907 = dma.done.wait (%p724_p1), [#allocation7], 16  }
 0x122   : > { %909 = vsyncadd (%p724_p1), [#allocation7], 4294967280 }
 0x123 PF: > { %s22_s20 = sadd.s32 1, %s932_s20   ;;  %s1130_s15 = smov %s916_s16 }
 0x124   : > { %p19_p2 = scmp.ge.s32.totalorder %s22_s20, 4   ;;  %s1131_s16 = smov %s920_s17 }
 0x125   : > { %s1132_s17 = smov %s1012_s27  ;;  %s1133_s18 = smov %s928_s19 }
 0x126   : > { %s1134_s19 = smov %s1136_s22  ;;  %21 = sbr.rel (!%p19_p2) target bundleno = 7 (0x7), region = 111 }
 0x12b   :  { %580 = vsyncpa [#allocation6], 1 }
 0x12c   :  { %582 = vsyncpa [#allocation6 + $0x1], 1 }
 0x12d   :  { %583 = vsyncpa [#allocation9], 1 }
 0x12e   :  { %585 = vsyncpa [#allocation9 + $0x1], 1 }
 0x12f   :  { %586 = vsyncpa [#allocation7], 1 }
 0x130   :  { %588 = vsyncpa [#allocation7 + $0x1], 1 }

</bundles_post_ra>
